<compile_context>
chip_gen: v6e
topology: v6e:2x2x1
jax: 0.10.0
libtpu: 0.0.40
codegen_flags: <defaults>
</compile_context>

<pallas_src>
import functools

import jax
import jax.numpy as jnp
from jax.experimental import pallas as pl
from jax.experimental.pallas import tpu as pltpu


_NEG = -1e30   # plain Python float -> jaxpr literal, NOT a captured traced constant


# ----------------------------- kernel helpers ------------------------------

def _linear(x, w_ref, b_ref):
    """x @ W + b; MXU operands in W's dtype, f32 accumulation, f32 bias add."""
    return jnp.dot(x.astype(w_ref.dtype), w_ref[...],
                   preferred_element_type=jnp.float32) + b_ref[...]


def _softmax_lastdim(logits):
    """Numerically stable softmax over the last axis (EUP approx reciprocal)."""
    m = jnp.max(logits, axis=-1, keepdims=True)
    e = jnp.exp(logits - m)
    s = jnp.sum(e, axis=-1, keepdims=True)
    return e * pl.reciprocal(s, approx=True)


# -------------------------------- kernels ----------------------------------

def _decoder_kernel_no_j(x_ref, w1_ref, b1_ref, w2_ref, b2_ref,
                         wh_ref, bh_ref, out_ref, *, num_v):
    h = jnp.maximum(_linear(x_ref[...], w1_ref, b1_ref), 0.0)
    # TODO(synk): training-mode dropout (p=n_drop) would use pltpu.prng_seed /
    # pltpu.prng_random_bits here; eval-mode dropout is identity.
    h = jnp.maximum(_linear(h, w2_ref, b2_ref), 0.0)
    # One fused MXU push for both heads:
    #   cols [0, num_v)           -> v logits
    #   cols [num_v, num_v+num_j) -> j logits
    #   remaining cols            -> bias -1e30 (exp -> 0, never contribute)
    logits = _linear(h, wh_ref, bh_ref)
    col = jax.lax.broadcasted_iota(jnp.int32, logits.shape, 1)
    is_v = col < num_v
    # Fused dual softmax: ONE exp pass over the lane-padded slab.
    m_v = jnp.max(jnp.where(is_v, logits, _NEG), axis=-1, keepdims=True)
    m_j = jnp.max(jnp.where(is_v, _NEG, logits), axis=-1, keepdims=True)
    e = jnp.exp(logits - jnp.where(is_v, m_v, m_j))
    s_v = jnp.sum(jnp.where(is_v, e, 0.0), axis=-1, keepdims=True)
    s_j = jnp.sum(jnp.where(is_v, 0.0, e), axis=-1, keepdims=True)
    inv = jnp.where(is_v, pl.reciprocal(s_v, approx=True),
                    pl.reciprocal(s_j, approx=True))
    out_ref[...] = e * inv          # disjoint support -> [v_soft | j_soft | 0]


def _decoder_kernel_use_j(x_ref, w1_ref, b1_ref, w2_ref, b2_ref,
                          wj_ref, bj_ref, wvih_ref, wvij_ref, bvi_ref,
                          wv_ref, bv_ref, out_ref):
    h = jnp.maximum(_linear(x_ref[...], w1_ref, b1_ref), 0.0)
    # TODO(synk): eval-mode dropout is identity (see no_j kernel comment).
    h = jnp.maximum(_linear(h, w2_ref, b2_ref), 0.0)
    # j head: weight columns were pre-shifted host-side so real j logits live at
    # columns [num_v, num_v+num_j); every other column carries bias -1e30 -> prob 0.
    j_soft = _softmax_lastdim(_linear(h, wj_ref, bj_ref))
    # torch.cat([h, j_gene], 1) @ W_vi == h @ W_vi[:H2] + j_slab @ W_vi_shifted
    # (W_vi's j rows live at rows [num_v, num_v+num_j) of wvij; zero rows elsewhere,
    #  so the padded/zero columns of j_soft contribute nothing -- no concat, no slice).
    vi = (_linear(h, wvih_ref, bvi_ref)
          + jnp.dot(j_soft.astype(wvij_ref.dtype), wvij_ref[...],
                    preferred_element_type=jnp.float32))
    # TODO(synk): the wj and wvih matmuls share LHS h and could be fused into one
    # MXU push (marginal win; kernel is HBM-bound).
    v_soft = _softmax_lastdim(_linear(vi, wv_ref, bv_ref))
    out_ref[...] = v_soft + j_soft   # disjoint support -> [v_soft | j_soft | 0]


# ------------------------------ host helpers -------------------------------

def _round_up(n, m):
    return ((n + m - 1) // m) * m


def _place_cols(a, left, total, fill=0.0):
    """Place a's columns at [left, left + a.shape[1]) in a `total`-wide matrix."""
    n, c = a.shape
    lhs = jnp.full((n, left), fill, a.dtype)
    rhs = jnp.full((n, total - left - c), fill, a.dtype)
    return jnp.concatenate([lhs, a, rhs], axis=1)


def init_decoder_params(key, inp_dim, num_v_genes, num_j_genes,
                        hidden_layer_sizes=(128, 64), use_j=False):
    """Deterministic PyTorch-style (uniform +/- 1/sqrt(fan_in)) init."""
    def linear(k, fan_in, fan_out):
        kw, kb = jax.random.split(k)
        bound = 1.0 / float(fan_in) ** 0.5
        w = jax.random.uniform(kw, (fan_in, fan_out), jnp.float32, -bound, bound)
        b = jax.random.uniform(kb, (1, fan_out), jnp.float32, -bound, bound)
        return w, b

    keys = jax.random.split(key, 5)
    h1, h2 = hidden_layer_sizes
    params = {}
    params["w1"], params["b1"] = linear(keys[0], inp_dim, h1)
    params["w2"], params["b2"] = linear(keys[1], h1, h2)
    params["wj"], params["bj"] = linear(keys[2], h2, num_j_genes)
    params["wv"], params["bv"] = linear(keys[3], h2, num_v_genes)
    if use_j:
        params["wvi"], params["bvi"] = linear(keys[4], h2 + num_j_genes, h2)
    return params


def prepare_decoder_params(params, use_j=False, mxu_dtype=jnp.bfloat16):
    """One-time host-side weight prep (hoisted out of the jitted forward)."""
    H2 = params["w2"].shape[1]
    num_j = params["wj"].shape[1]
    num_v = params["wv"].shape[1]
    np_out = _round_up(num_v + num_j, 128)

    w1 = params["w1"].astype(mxu_dtype)
    w2 = params["w2"].astype(mxu_dtype)
    b1 = params["b1"].astype(jnp.float32)
    b2 = params["b2"].astype(jnp.float32)

    if not use_j:
        wh = _place_cols(jnp.concatenate([params["wv"], params["wj"]], axis=1),
                         0, np_out).astype(mxu_dtype)
        bh = _place_cols(jnp.concatenate([params["bv"], params["bj"]], axis=1),
                         0, np_out, fill=_NEG).astype(jnp.float32)
        weights = (w1, b1, w2, b2, wh, bh)
    else:
        # j head pre-shifted into columns [num_v, num_v+num_j) of the output slab.
        wj = _place_cols(params["wj"], num_v, np_out).astype(mxu_dtype)
        bj = _place_cols(params["bj"], num_v, np_out, fill=_NEG).astype(jnp.float32)
        wvi = params["wvi"]
        wvih = wvi[:H2, :].astype(mxu_dtype)
        wvij = jnp.concatenate(
            [jnp.zeros((num_v, H2), wvi.dtype),
             wvi[H2:, :],
             jnp.zeros((np_out - num_v - num_j, H2), wvi.dtype)],
            axis=0).astype(mxu_dtype)
        bvi = params["bvi"].astype(jnp.float32)
        wv = _place_cols(params["wv"], 0, np_out).astype(mxu_dtype)
        bv = _place_cols(params["bv"], 0, np_out, fill=_NEG).astype(jnp.float32)
        weights = (w1, b1, w2, b2, wj, bj, wvih, wvij, bvi, wv, bv)

    return dict(weights=weights, num_v=num_v, num_j=num_j,
                np_out=np_out, use_j=use_j)


# --------------------------------- wrapper ----------------------------------

@functools.partial(jax.jit,
                   static_argnames=("use_j", "num_v", "num_j", "np_out",
                                    "tile_b", "compact"))
def _decoder_forward(x, weights, *, use_j, num_v, num_j, np_out, tile_b, compact):
    B, F = x.shape
    # Batch tiling over the grid; weights use constant-index resident blocks.
    tile_b = max(8, min(_round_up(tile_b, 8), _round_up(B, 8)))
    grid = (pl.cdiv(B, tile_b),)   # for v7x megacore, prefer an even grid when B is large

    def resident(arr):             # whole-array block, same block every step -> stays in VMEM
        return pl.BlockSpec(arr.shape, lambda i: (0, 0))

    in_specs = ([pl.BlockSpec((tile_b, F), lambda i: (i, 0))]
                + [resident(w) for w in weights])
    out_specs = pl.BlockSpec((tile_b, np_out), lambda i: (i, 0))
    out_shape = jax.ShapeDtypeStruct((B, np_out), jnp.float32)

    kernel = (_decoder_kernel_use_j if use_j
              else functools.partial(_decoder_kernel_no_j, num_v=num_v))

    H1 = weights[0].shape[1]
    H2 = weights[2].shape[1]
    flops = 2 * B * (F * H1 + H1 * H2 + H2 * np_out)
    if use_j:
        flops += 2 * B * (H2 * H2 + np_out * H2 + H2 * np_out)
    bytes_accessed = int(x.size * x.dtype.itemsize
                         + sum(int(w.size) * w.dtype.itemsize for w in weights)
                         + B * np_out * 4)
    cost = pl.CostEstimate(flops=int(flops),
                           transcendentals=int(B * np_out * (2 if use_j else 1)),
                           bytes_accessed=bytes_accessed)

    out = pl.pallas_call(
        kernel,
        grid=grid,
        in_specs=in_specs,
        out_specs=out_specs,
        out_shape=out_shape,
        compiler_params=pltpu.CompilerParams(
            dimension_semantics=("parallel",),
            vmem_limit_bytes=32 * 1024 * 1024),
        cost_estimate=cost,
    )(x, *weights)

    if not compact:
        return out  # lane-dense [v_soft | j_soft | pad] slab; consumers index lazily
    # NOTE: compaction is an extra HBM pass over the slab -- only use when a dense
    # (B, num_v)/(B, num_j) layout is mandatory downstream.
    return out[:, :num_v], out[:, num_v:num_v + num_j]


def decoder_dropout_forward(x, prepped, tile_b=1024, compact=True):
    """Forward pass. `prepped` comes from prepare_decoder_params()."""
    return _decoder_forward(
        x, prepped["weights"],
        use_j=prepped["use_j"], num_v=prepped["num_v"], num_j=prepped["num_j"],
        np_out=prepped["np_out"], tile_b=tile_b, compact=compact)


# ------------------------------- reference ----------------------------------

def _reference_forward(x, params, use_j=False):
    def sm(z):
        z = z - jnp.max(z, axis=-1, keepdims=True)
        e = jnp.exp(z)
        return e / jnp.sum(e, axis=-1, keepdims=True)
    h = jnp.maximum(x @ params["w1"] + params["b1"], 0.0)
    h = jnp.maximum(h @ params["w2"] + params["b2"], 0.0)
    j = sm(h @ params["wj"] + params["bj"])
    if not use_j:
        v = sm(h @ params["wv"] + params["bv"])
    else:
        cat = jnp.concatenate([h, j], axis=1)
        vi = cat @ params["wvi"] + params["bvi"]
        v = sm(vi @ params["wv"] + params["bv"])
    return v, j


if __name__ == "__main__":
    # B deliberately not a tile multiple -> exercises the partial last grid tile.
    B, INP_DIM = 300, 48
    HIDDEN = (128, 64)
    NUM_V, NUM_J = 24, 12
    TILE_B = 128          # 3 grid steps here; production default is 1024

    key = jax.random.PRNGKey(0)
    kx, kp = jax.random.split(key)
    x = jax.random.normal(kx, (B, INP_DIM), dtype=jnp.float32)
    params = init_decoder_params(kp, INP_DIM, NUM_V, NUM_J,
                                 hidden_layer_sizes=HIDDEN, use_j=True)

    rv0, rj0 = _reference_forward(x, params, use_j=False)
    rv1, rj1 = _reference_forward(x, params, use_j=True)

    # use_j=False, f32 MXU operands (tight tolerance check).
    prep0_f32 = prepare_decoder_params(params, use_j=False, mxu_dtype=jnp.float32)
    v0, j0 = decoder_dropout_forward(x, prep0_f32, tile_b=TILE_B)
    jax.block_until_ready((v0, j0))
    assert v0.shape == (B, NUM_V) and j0.shape == (B, NUM_J)
    assert jnp.allclose(v0, rv0, atol=3e-3), "v_gene mismatch (use_j=False, f32)"
    assert jnp.allclose(j0, rj0, atol=3e-3), "j_gene mismatch (use_j=False, f32)"
    assert jnp.allclose(jnp.sum(v0, -1), 1.0, atol=5e-3), "v rows not normalized"
    assert jnp.allclose(jnp.sum(j0, -1), 1.0, atol=5e-3), "j rows not normalized"

    # use_j=False, default bf16 MXU operands (recommended on v5e/v6e/v7x).
    prep0_bf = prepare_decoder_params(params, use_j=False)
    vb, jb = decoder_dropout_forward(x.astype(jnp.bfloat16), prep0_bf, tile_b=TILE_B)
    jax.block_until_ready((vb, jb))
    assert jnp.allclose(vb, rv0, atol=5e-2), "v_gene mismatch (use_j=False, bf16)"
    assert jnp.allclose(jb, rj0, atol=5e-2), "j_gene mismatch (use_j=False, bf16)"

    # use_j=True, f32 and bf16; single fused [v | j | pad] output slab.
    prep1_f32 = prepare_decoder_params(params, use_j=True, mxu_dtype=jnp.float32)
    v1, j1 = decoder_dropout_forward(x, prep1_f32, tile_b=TILE_B)
    jax.block_until_ready((v1, j1))
    assert jnp.allclose(v1, rv1, atol=3e-3), "v_gene mismatch (use_j=True, f32)"
    assert jnp.allclose(j1, rj1, atol=3e-3), "j_gene mismatch (use_j=True, f32)"

    prep1_bf = prepare_decoder_params(params, use_j=True)
    v2, j2 = decoder_dropout_forward(x.astype(jnp.bfloat16), prep1_bf, tile_b=TILE_B)
    jax.block_until_ready((v2, j2))
    assert jnp.allclose(v2, rv1, atol=5e-2), "v_gene mismatch (use_j=True, bf16)"
    assert jnp.allclose(j2, rj1, atol=5e-2), "j_gene mismatch (use_j=True, bf16)"

    # Slab output mode (no post-kernel compaction pass).
    slab = decoder_dropout_forward(x, prep1_f32, tile_b=TILE_B, compact=False)
    jax.block_until_ready(slab)
    assert slab.shape == (B, prep1_f32["np_out"])
    assert jnp.allclose(slab[:, :NUM_V], rv1, atol=3e-3), "slab v mismatch"
    assert jnp.allclose(slab[:, NUM_V:NUM_V + NUM_J], rj1, atol=3e-3), "slab j mismatch"

    print("KERNEL_OK")
</pallas_src>

<mosaic_0001>
module attributes {stable_mosaic.version = 11 : i64} {
  func.func @_decoder_kernel_no_j(%arg0: i32, %arg1: memref<128x48xf32, #tpu.memory_space<vmem>>, %arg2: memref<48x128xf32, #tpu.memory_space<vmem>>, %arg3: memref<1x128xf32, #tpu.memory_space<vmem>>, %arg4: memref<128x64xf32, #tpu.memory_space<vmem>>, %arg5: memref<1x64xf32, #tpu.memory_space<vmem>>, %arg6: memref<64x128xf32, #tpu.memory_space<vmem>>, %arg7: memref<1x128xf32, #tpu.memory_space<vmem>>, %arg8: memref<128x128xf32, #tpu.memory_space<vmem>>) attributes {dimension_semantics = [#tpu.dimension_semantics<parallel>], iteration_bounds = array<i64: 3>, scalar_prefetch = 0 : i64, scratch_operands = 0 : i64, tpu.core_type = #tpu.core_type<tc>, window_params = [{transform_indices = @transform_0, window_bounds = array<i64: 128, 48>}, {pipeline_mode = #tpu.pipeline_mode<synchronous>, transform_indices = @transform_1, window_bounds = array<i64: 48, 128>}, {pipeline_mode = #tpu.pipeline_mode<synchronous>, transform_indices = @transform_2, window_bounds = array<i64: 1, 128>}, {pipeline_mode = #tpu.pipeline_mode<synchronous>, transform_indices = @transform_3, window_bounds = array<i64: 128, 64>}, {pipeline_mode = #tpu.pipeline_mode<synchronous>, transform_indices = @transform_4, window_bounds = array<i64: 1, 64>}, {pipeline_mode = #tpu.pipeline_mode<synchronous>, transform_indices = @transform_5, window_bounds = array<i64: 64, 128>}, {pipeline_mode = #tpu.pipeline_mode<synchronous>, transform_indices = @transform_6, window_bounds = array<i64: 1, 128>}, {transform_indices = @transform_7, window_bounds = array<i64: 128, 128>}]} {
    %c0 = arith.constant 0 : index
    %c0_0 = arith.constant 0 : index
    %0 = vector.load %arg1[%c0, %c0_0] : memref<128x48xf32, #tpu.memory_space<vmem>>, vector<128x48xf32>
    %c0_1 = arith.constant 0 : index
    %c0_2 = arith.constant 0 : index
    %1 = vector.load %arg2[%c0_1, %c0_2] : memref<48x128xf32, #tpu.memory_space<vmem>>, vector<48x128xf32>
    %cst = arith.constant dense<0.000000e+00> : vector<128x128xf32>
    %2 = tpu.matmul %0, %1, %cst {dimension_numbers = #tpu.dot_dimension_numbers<[1], [0], [0], [1], [0, 0, 1, 1], [], []>} : vector<128x48xf32>, vector<48x128xf32>, vector<128x128xf32> -> vector<128x128xf32>
    %c0_3 = arith.constant 0 : index
    %c0_4 = arith.constant 0 : index
    %3 = vector.load %arg3[%c0_3, %c0_4] : memref<1x128xf32, #tpu.memory_space<vmem>>, vector<1x128xf32>
    %4 = vector.broadcast %3 : vector<1x128xf32> to vector<128x128xf32>
    %5 = arith.addf %2, %4 : vector<128x128xf32>
    %cst_5 = arith.constant 0.000000e+00 : f32
    %6 = vector.broadcast %cst_5 : f32 to vector<128x128xf32>
    %7 = arith.maximumf %5, %6 : vector<128x128xf32>
    %c0_6 = arith.constant 0 : index
    %c0_7 = arith.constant 0 : index
    %8 = vector.load %arg4[%c0_6, %c0_7] : memref<128x64xf32, #tpu.memory_space<vmem>>, vector<128x64xf32>
    %cst_8 = arith.constant dense<0.000000e+00> : vector<128x64xf32>
    %9 = tpu.matmul %7, %8, %cst_8 {dimension_numbers = #tpu.dot_dimension_numbers<[1], [0], [0], [1], [0, 0, 1, 1], [], []>} : vector<128x128xf32>, vector<128x64xf32>, vector<128x64xf32> -> vector<128x64xf32>
    %c0_9 = arith.constant 0 : index
    %c0_10 = arith.constant 0 : index
    %10 = vector.load %arg5[%c0_9, %c0_10] : memref<1x64xf32, #tpu.memory_space<vmem>>, vector<1x64xf32>
    %11 = vector.broadcast %10 : vector<1x64xf32> to vector<128x64xf32>
    %12 = arith.addf %9, %11 : vector<128x64xf32>
    %cst_11 = arith.constant 0.000000e+00 : f32
    %13 = vector.broadcast %cst_11 : f32 to vector<128x64xf32>
    %14 = arith.maximumf %12, %13 : vector<128x64xf32>
    %c0_12 = arith.constant 0 : index
    %c0_13 = arith.constant 0 : index
    %15 = vector.load %arg6[%c0_12, %c0_13] : memref<64x128xf32, #tpu.memory_space<vmem>>, vector<64x128xf32>
    %cst_14 = arith.constant dense<0.000000e+00> : vector<128x128xf32>
    %16 = tpu.matmul %14, %15, %cst_14 {dimension_numbers = #tpu.dot_dimension_numbers<[1], [0], [0], [1], [0, 0, 1, 1], [], []>} : vector<128x64xf32>, vector<64x128xf32>, vector<128x128xf32> -> vector<128x128xf32>
    %c0_15 = arith.constant 0 : index
    %c0_16 = arith.constant 0 : index
    %17 = vector.load %arg7[%c0_15, %c0_16] : memref<1x128xf32, #tpu.memory_space<vmem>>, vector<1x128xf32>
    %18 = vector.broadcast %17 : vector<1x128xf32> to vector<128x128xf32>
    %19 = arith.addf %16, %18 : vector<128x128xf32>
    %20 = tpu.iota {dimensions = array<i32: 1>} : vector<128x128xi32>
    %c24_i32 = arith.constant 24 : i32
    %21 = vector.broadcast %c24_i32 : i32 to vector<128x128xi32>
    %22 = arith.cmpi slt, %20, %21 : vector<128x128xi32>
    %cst_17 = arith.constant -1.000000e+30 : f32
    %23 = vector.broadcast %cst_17 : f32 to vector<128x128xf32>
    %24 = arith.select %22, %19, %23 : vector<128x128xi1>, vector<128x128xf32>
    %cst_18 = arith.constant dense<0xFF800000> : vector<128xf32>
    %25 = vector.multi_reduction <maximumf>, %24, %cst_18 [1] : vector<128x128xf32> to vector<128xf32>
    %26 = vector.shape_cast %25 : vector<128xf32> to vector<128x1xf32>
    %cst_19 = arith.constant -1.000000e+30 : f32
    %27 = vector.broadcast %cst_19 : f32 to vector<128x128xf32>
    %28 = arith.select %22, %27, %19 : vector<128x128xi1>, vector<128x128xf32>
    %cst_20 = arith.constant dense<0xFF800000> : vector<128xf32>
    %29 = vector.multi_reduction <maximumf>, %28, %cst_20 [1] : vector<128x128xf32> to vector<128xf32>
    %30 = vector.shape_cast %29 : vector<128xf32> to vector<128x1xf32>
    %31 = vector.shape_cast %26 : vector<128x1xf32> to vector<128x1xf32>
    %32 = vector.broadcast %31 : vector<128x1xf32> to vector<128x128xf32>
    %33 = vector.shape_cast %30 : vector<128x1xf32> to vector<128x1xf32>
    %34 = vector.broadcast %33 : vector<128x1xf32> to vector<128x128xf32>
    %35 = arith.select %22, %32, %34 : vector<128x128xi1>, vector<128x128xf32>
    %36 = arith.subf %19, %35 : vector<128x128xf32>
    %37 = math.exp %36 : vector<128x128xf32>
    %cst_21 = arith.constant 0.000000e+00 : f32
    %38 = vector.broadcast %cst_21 : f32 to vector<128x128xf32>
    %39 = arith.select %22, %37, %38 : vector<128x128xi1>, vector<128x128xf32>
    %cst_22 = arith.constant dense<0.000000e+00> : vector<128xf32>
    %40 = vector.multi_reduction <add>, %39, %cst_22 [1] : vector<128x128xf32> to vector<128xf32>
    %41 = vector.shape_cast %40 : vector<128xf32> to vector<128x1xf32>
    %cst_23 = arith.constant 0.000000e+00 : f32
    %42 = vector.broadcast %cst_23 : f32 to vector<128x128xf32>
    %43 = arith.select %22, %42, %37 : vector<128x128xi1>, vector<128x128xf32>
    %cst_24 = arith.constant dense<0.000000e+00> : vector<128xf32>
    %44 = vector.multi_reduction <add>, %43, %cst_24 [1] : vector<128x128xf32> to vector<128xf32>
    %45 = vector.shape_cast %44 : vector<128xf32> to vector<128x1xf32>
    %46 = tpu.reciprocal %41 {approx = true} : vector<128x1xf32> -> vector<128x1xf32>
    %47 = tpu.reciprocal %45 {approx = true} : vector<128x1xf32> -> vector<128x1xf32>
    %48 = vector.shape_cast %46 : vector<128x1xf32> to vector<128x1xf32>
    %49 = vector.broadcast %48 : vector<128x1xf32> to vector<128x128xf32>
    %50 = vector.shape_cast %47 : vector<128x1xf32> to vector<128x1xf32>
    %51 = vector.broadcast %50 : vector<128x1xf32> to vector<128x128xf32>
    %52 = arith.select %22, %49, %51 : vector<128x128xi1>, vector<128x128xf32>
    %53 = arith.mulf %37, %52 : vector<128x128xf32>
    %c0_25 = arith.constant 0 : index
    %c0_26 = arith.constant 0 : index
    %54 = vector.load %arg8[%c0_25, %c0_26] : memref<128x128xf32, #tpu.memory_space<vmem>>, vector<128x128xf32>
    tpu.vector_store %arg8[%c0_25, %c0_26], %53 {strides = array<i32>} : memref<128x128xf32, #tpu.memory_space<vmem>>, vector<128x128xf32>,
    return
  }
  func.func @transform_0(%arg0: i32) -> (i32, i32) {
    %c0_i32 = arith.constant 0 : i32
    %c0_i32_0 = arith.constant 0 : i32
    return %arg0, %c0_i32 : i32, i32
  }
  func.func @transform_1(%arg0: i32) -> (i32, i32) {
    %c0_i32 = arith.constant 0 : i32
    %c0_i32_0 = arith.constant 0 : i32
    %c0_i32_1 = arith.constant 0 : i32
    return %c0_i32, %c0_i32_0 : i32, i32
  }
  func.func @transform_2(%arg0: i32) -> (i32, i32) {
    %c0_i32 = arith.constant 0 : i32
    %c0_i32_0 = arith.constant 0 : i32
    %c0_i32_1 = arith.constant 0 : i32
    return %c0_i32, %c0_i32_0 : i32, i32
  }
  func.func @transform_3(%arg0: i32) -> (i32, i32) {
    %c0_i32 = arith.constant 0 : i32
    %c0_i32_0 = arith.constant 0 : i32
    %c0_i32_1 = arith.constant 0 : i32
    return %c0_i32, %c0_i32_0 : i32, i32
  }
  func.func @transform_4(%arg0: i32) -> (i32, i32) {
    %c0_i32 = arith.constant 0 : i32
    %c0_i32_0 = arith.constant 0 : i32
    %c0_i32_1 = arith.constant 0 : i32
    return %c0_i32, %c0_i32_0 : i32, i32
  }
  func.func @transform_5(%arg0: i32) -> (i32, i32) {
    %c0_i32 = arith.constant 0 : i32
    %c0_i32_0 = arith.constant 0 : i32
    %c0_i32_1 = arith.constant 0 : i32
    return %c0_i32, %c0_i32_0 : i32, i32
  }
  func.func @transform_6(%arg0: i32) -> (i32, i32) {
    %c0_i32 = arith.constant 0 : i32
    %c0_i32_0 = arith.constant 0 : i32
    %c0_i32_1 = arith.constant 0 : i32
    return %c0_i32, %c0_i32_0 : i32, i32
  }
  func.func @transform_7(%arg0: i32) -> (i32, i32) {
    %c0_i32 = arith.constant 0 : i32
    %c0_i32_0 = arith.constant 0 : i32
    return %arg0, %c0_i32 : i32, i32
  }
}

</mosaic_0001>

<bundles_post_ra>
// kernel: _decoder_forward.1
= control target key start
LH: loop header
LB: loop body
LE: loop exit
PB: predicated region body
PF: predicated region fallthrough
CT: control target
= control target key end

     0   :  { %s2147_s24 = smov 0   ;;  %s2149_s25 = smov 0   ;;  %s2843_s0 = inlined_call_operand.vmem [shape: f32[300,48], index: 0, kind: input, shape index: {}]   ;;  %s2844_s1 = inlined_call_operand.vmem [shape: f32[48,128], index: 1, kind: input, shape index: {}]   ;;  %s2845_s2 = inlined_call_operand.vmem [shape: f32[1,128], index: 2, kind: input, shape index: {}]   ;;  %s2846_s3 = inlined_call_operand.vmem [shape: f32[128,64], index: 3, kind: input, shape index: {}]   ;;  %s2847_s4 = inlined_call_operand.vmem [shape: f32[1,64], index: 4, kind: input, shape index: {}]   ;;  %s2848_s5 = inlined_call_operand.vmem [shape: f32[64,128], index: 5, kind: input, shape index: {}]   ;;  %s2849_s6 = inlined_call_operand.vmem [shape: f32[1,128], index: 6, kind: input, shape index: {}]   ;;  %s2850_s7 = inlined_call_operand.vmem [shape: f32[300,128], index: 7, kind: output, shape index: {}]  }
   0x1   :  { %s2151_s26 = smov 0  }
   0x2 LB: > { %s2160_s27 = sadd.s32 4294967295, %s2073_s26   ;;  %s2162_s28 = sadd.s32 1, %s2073_s26   ;;  %s2073_s26 = sphi %s2151_s26, %s2857_s26   ;;  %s2069_s25 = sphi %s2149_s25, %s2856_s25   ;;  %s2065_s24 = sphi %s2147_s24, %s2855_s24  }
   0x3   : > { %s173_s29 = ssub.s32 %s2073_s26, %s2162_s28  ;;  %s176_s30 = sadd.s32 1, %s2069_s25 }
   0x4   : > { %p174_p0 = scmp.eq.s32.totalorder %s173_s29, 0  ;;  %p186_p1 = scmp.ne.s32.totalorder %s2069_s25, %s2065_s24 }
   0x5   : > { %p187_p2 = scmp.eq.s32.totalorder %s2160_s27, 2  ;;  %p1550_p3 = scmp.ge.s32.totalorder %s2073_s26, 1 }
   0x6   : > { %s2170_s8 = scalar_select %p174_p0, %s2069_s25, %s176_s30  }
   0x7   : > { %p2172_p4 = por %p187_p2, %p186_p1  ;;  %p246_p5 = scmp.lt.s32.totalorder %s2073_s26, 4 }
   0x9   : > { %p247_p6 = pnand %p1550_p3, %p246_p5 }
   0xa   : > { %s2183_s14 = sshll.u32 (!%p247_p6), %s2160_s27, 4  ;;  %s278_s19 = sand.u32 (!%p247_p6), 1, %s2065_s24  }
   0xb   : > { %250 = sbr.rel (%p247_p6) target bundleno = 1049 (0x419), region = 48  ;;  %p286_p7 = scmp.lt.s32.totalorder (!%p247_p6), %s2183_s14, 37 }
   0xc   : > { %s1551_s20 = sshll.u32 (!%p247_p6), %s278_s19, 7 }
  0x10   : > { %v321_v0 = vld [vmem:[%s2844_s1 + $0x28] sm:$0xff]  ;;  %v320_v1 = vld [vmem:[%s2844_s1 + $0x20] sm:$0xff]  ;;  %v319_v2 = vld [vmem:[%s2844_s1 + $0x18] sm:$0xff]  ;;  %s287_s21 = scalar_select %p286_p7, %s2183_s14, 37  ;;  %vm329_vm0 = vcmask 392192   ;;  %vm738_vm1 = vcmask 523264  }
  0x11   : > { %1687 = vmatprep.subr.mxu0 %v321_v0  ;;  %v554_v3 = vld [vmem:[%s2846_s3 + $0x78] sm:$0xff]  ;;  %v553_v4 = vld [vmem:[%s2846_s3 + $0x70] sm:$0xff]  ;;  %v552_v6 = vld [vmem:[%s2846_s3 + $0x68] sm:$0xff]  ;;  %s1279_s24 = ssub.s32 (%p2172_p4), 38, %s2183_s14  ;;  %s1606_s22 = sshll.u32 (%p2172_p4), %s2160_s27, 7 }
  0x12   : > { %1688 = vmatpush3.msra.mxu0 %v321_v0  ;;  %1723 = vmatprep.subr.mxu1 %v554_v3  ;;  %v318_v5 = vld [vmem:[%s2844_s1 + $0x10] sm:$0xff]  ;;  %s1553_s30 = sshll.u32 %s287_s21, 3  ;;  %v317_v7 = vld [vmem:[%s2844_s1 + $0x8] sm:$0xff]  ;;  %v551_v9 = vld [vmem:[%s2846_s3 + $0x60] sm:$0xff]  ;;  %s2680_s21 = scalar_lea.vmem [#allocation2], %s1551_s20  }
  0x13   : > { %1689 = vmatprep.subr.mxu0 %v320_v1  ;;  %1724 = vmatpush3.msra.mxu1 %v554_v3  ;;  %s2208_s15 = scalar_lea.vmem %s2843_s0, %s1553_s30  ;;  %v316_v10 = vld [vmem:[%s2844_s1] sm:$0xff]  ;;  %v550_v11 = vld [vmem:[%s2846_s3 + $0x58] sm:$0xff]  ;;  %v549_v14 = vld [vmem:[%s2846_s3 + $0x50] sm:$0xff]  ;;  %p1280_p8 = scmp.lt.s32.totalorder (%p2172_p4), %s1279_s24, 16 }
  0x14   : > { %1690 = vmatpush3.msra.mxu0 %v320_v1  ;;  %1725 = vmatprep.subr.mxu1 %v553_v4  ;;  %v300_v8 = vld [vmem:[%s2208_s15] sm:$0xff]  ;;  %v301_v12 = vld [vmem:[%s2208_s15 + $0x8] sm:$0xff]  ;;  %v302_v13 = vld [vmem:[%s2208_s15 + $0x10] sm:$0xff]  ;;  %s2750_s29 = scalar_lea.vmem (%p2172_p4), %s2850_s7, %s1606_s22  }
  0x15   : > { %1691 = vmatprep.subr.mxu0 %v319_v2  ;;  %1726 = vmatpush3.msra.mxu1 %v553_v4  ;;  %v548_v15 = vld [vmem:[%s2846_s3 + $0x48] sm:$0xff]  ;;  %v303_v16 = vld [vmem:[%s2208_s15 + $0x18] sm:$0xff]  ;;  %v304_v17 = vld [vmem:[%s2208_s15 + $0x20] sm:$0xff] }
  0x16   : > { %1692 = vmatpush3.msra.mxu0 %v319_v2  ;;  %1727 = vmatprep.subr.mxu1 %v552_v6  ;;  %v547_v18 = vld [vmem:[%s2846_s3 + $0x40] sm:$0xff]  ;;  %v546_v19 = vld [vmem:[%s2846_s3 + $0x38] sm:$0xff]  ;;  %v305_v20 = vld [vmem:[%s2208_s15 + $0x28] sm:$0xff] }
  0x17   : > { %1693 = vmatprep.subr.mxu0 %v318_v5  ;;  %1699 = vmatprep.mubr.msk.f32.mxu0 %vm329_vm0, %v300_v8  ;;  %v306_v21 = vld [vmem:[%s2208_s15 + $0x30] sm:$0xff]  ;;  %v544_v23 = vld [vmem:[%s2846_s3 + $0x28] sm:$0xff]  ;;  %v307_v24 = vld [vmem:[%s2208_s15 + $0x38] sm:$0xff] }
  0x18   : > { %1694 = vmatpush3.msra.mxu0 %v318_v5  ;;  %1728 = vmatpush3.msra.mxu1 %v552_v6  ;;  %v545_v22 = vld [vmem:[%s2846_s3 + $0x30] sm:$0xff]  ;;  %v308_v25 = vld [vmem:[%s2208_s15 + $0x40] sm:$0xff]  ;;  %v309_v27 = vld [vmem:[%s2208_s15 + $0x48] sm:$0xff] }
  0x19   : > { %1695 = vmatprep.subr.mxu0 %v317_v7  ;;  %1729 = vmatprep.subr.mxu1 %v551_v9  ;;  %v543_v26 = vld [vmem:[%s2846_s3 + $0x20] sm:$0xff]  ;;  %v310_v28 = vld [vmem:[%s2208_s15 + $0x50] sm:$0xff]  ;;  %v311_v29 = vld [vmem:[%s2208_s15 + $0x58] sm:$0xff] }
  0x1a   : > { %1696 = vmatpush3.msra.mxu0 %v317_v7  ;;  %1730 = vmatpush3.msra.mxu1 %v551_v9  ;;  %v312_v30 = vld [vmem:[%s2208_s15 + $0x60] sm:$0xff]  ;;  %v313_v31 = vld [vmem:[%s2208_s15 + $0x68] sm:$0xff]  ;;  %v314_v32 = vld [vmem:[%s2208_s15 + $0x70] sm:$0xff] }
  0x1b   : > { %1697 = vmatprep.subr.mxu0 %v316_v10  ;;  %1731 = vmatprep.subr.mxu1 %v550_v11  ;;  %v315_v33 = vld [vmem:[%s2208_s15 + $0x78] sm:$0xff]  ;;  %v541_v35 = vld [vmem:[%s2846_s3 + $0x10] sm:$0xff]  ;;  %v540_v36 = vld [vmem:[%s2846_s3 + $0x8] sm:$0xff] }
  0x1c   : > { %1698 = vmatpush3.msra.mxu0 %v316_v10  ;;  %1732 = vmatpush3.msra.mxu1 %v550_v11  ;;  %v542_v34 = vld [vmem:[%s2846_s3 + $0x18] sm:$0xff]  ;;  %v539_v37 = vld [vmem:[%s2846_s3] sm:$0xff]  ;;  %v729_v39 = vld [vmem:[%s2848_s5 + $0x30] sm:$0xff] }
  0x1d   : > { %1700 = vmatmul.mubr.msk.f32.vlgmr.msra.gmra.mxu0 %vm329_vm0, %v301_v12  ;;  %1733 = vmatprep.subr.mxu1 %v549_v14  ;;  %v730_v38 = vld [vmem:[%s2848_s5 + $0x38] sm:$0xff]  ;;  %v728_v40 = vld [vmem:[%s2848_s5 + $0x28] sm:$0xff]  ;;  %v727_v41 = vld [vmem:[%s2848_s5 + $0x20] sm:$0xff] }
  0x1e   : > { %1702 = vmatprep.mubr.msk.f32.mxu0 %vm329_vm0, %v302_v13  ;;  %1734 = vmatpush3.msra.mxu1 %v549_v14  ;;  %v726_v42 = vld [vmem:[%s2848_s5 + $0x18] sm:$0xff]  ;;  %v725_v43 = vld [vmem:[%s2848_s5 + $0x10] sm:$0xff]  ;;  %v724_v44 = vld [vmem:[%s2848_s5 + $0x8] sm:$0xff] }
  0x1f   : > { %1735 = vmatprep.subr.mxu1 %v548_v15  ;;  %1779 = vmatprep.subr.mxu0 %v730_v38  ;;  %v2308_v45 = vld [vmem:[%s2845_s2] ss:$0 sm:$0xff] }
  0x20   : > { %1736 = vmatpush3.msra.mxu1 %v548_v15  ;;  %1780 = vmatpush3.msra.mxu0 %v730_v38 }
  0x21   : > { %1703 = vmatmul.mubr.msk.f32.gmra.mxu0 %vm329_vm0, %v303_v16  ;;  %1737 = vmatprep.subr.mxu1 %v547_v18 }
  0x22   : > { %1705 = vmatprep.mubr.msk.f32.mxu0 %vm329_vm0, %v304_v17  ;;  %1738 = vmatpush3.msra.mxu1 %v547_v18 }
  0x23   : > { %1739 = vmatprep.subr.mxu1 %v546_v19  ;;  %1781 = vmatprep.subr.mxu0 %v729_v39 }
  0x24   : > { %1740 = vmatpush3.msra.mxu1 %v546_v19  ;;  %1782 = vmatpush3.msra.mxu0 %v729_v39 }
  0x25   : > { %1706 = vmatmul.mubr.msk.f32.gmra.mxu0 %vm329_vm0, %v305_v20  ;;  %1741 = vmatprep.subr.mxu1 %v545_v22 }
  0x26   : > { %1708 = vmatprep.mubr.msk.f32.mxu0 %vm329_vm0, %v306_v21  ;;  %1742 = vmatpush3.msra.mxu1 %v545_v22 }
  0x27   : > { %1743 = vmatprep.subr.mxu1 %v544_v23  ;;  %1783 = vmatprep.subr.mxu0 %v728_v40 }
  0x28   : > { %1744 = vmatpush3.msra.mxu1 %v544_v23  ;;  %1784 = vmatpush3.msra.mxu0 %v728_v40 }
  0x29   : > { %1709 = vmatmul.mubr.msk.f32.gmra.mxu0 %vm329_vm0, %v307_v24  ;;  %1745 = vmatprep.subr.mxu1 %v543_v26 }
  0x2a   : > { %1711 = vmatprep.mubr.msk.f32.mxu0 %vm329_vm0, %v308_v25  ;;  %1746 = vmatpush3.msra.mxu1 %v543_v26 }
  0x2b   : > { %1747 = vmatprep.subr.mxu1 %v542_v34  ;;  %1785 = vmatprep.subr.mxu0 %v727_v41 }
  0x2c   : > { %1748 = vmatpush3.msra.mxu1 %v542_v34  ;;  %1786 = vmatpush3.msra.mxu0 %v727_v41 }
  0x2d   : > { %1712 = vmatmul.mubr.msk.f32.gmra.mxu0 %vm329_vm0, %v309_v27  ;;  %1749 = vmatprep.subr.mxu1 %v541_v35 }
  0x2e   : > { %1714 = vmatprep.mubr.msk.f32.mxu0 %vm329_vm0, %v310_v28  ;;  %1750 = vmatpush3.msra.mxu1 %v541_v35 }
  0x2f   : > { %1751 = vmatprep.subr.mxu1 %v540_v36  ;;  %1787 = vmatprep.subr.mxu0 %v726_v42 }
  0x30   : > { %1752 = vmatpush3.msra.mxu1 %v540_v36  ;;  %1788 = vmatpush3.msra.mxu0 %v726_v42 }
  0x31   : > { %1715 = vmatmul.mubr.msk.f32.gmra.mxu0 %vm329_vm0, %v311_v29  ;;  %1753 = vmatprep.subr.mxu1 %v539_v37 }
  0x32   : > { %1717 = vmatprep.mubr.msk.f32.mxu0 %vm329_vm0, %v312_v30  ;;  %1754 = vmatpush3.msra.mxu1 %v539_v37  ;;  %v723_v30 = vld [vmem:[%s2848_s5] sm:$0xff] }
  0x33   : > { %1819 = vmatprep.subr.mxu1 %v730_v38  ;;  %1789 = vmatprep.subr.mxu0 %v725_v43 }
  0x34   : > { %1790 = vmatpush3.msra.mxu0 %v725_v43 }
  0x35   : > { %1718 = vmatmul.mubr.msk.f32.gmra.mxu0 %vm329_vm0, %v313_v31  ;;  %1791 = vmatprep.subr.mxu0 %v724_v44  ;;  %v1571_v31 = vld [vmem:[%s2847_s4] ss:$0 sm:$0xff] }
  0x36   : > { %1720 = vmatprep.mubr.msk.f32.mxu0 %vm329_vm0, %v314_v32  ;;  %1792 = vmatpush3.msra.mxu0 %v724_v44 }
  0x37   : > { %1793 = vmatprep.subr.mxu0 %v723_v30 }
  0x38   : > { %1794 = vmatpush3.msra.mxu0 %v723_v30 }
  0x39   : > { %1721 = vmatmul.mubr.msk.f32.gmra.mxu0 %vm329_vm0, %v315_v33 }
  0xdd   : > { %v1701_v46 = vpop.f32.mrf.mxu0 }
  0xde   : > { %v450_v47 = vadd.f32 %v1701_v46, %v2308_v45 }
  0xdf   : > { %v444_v48 = vpop.f32.mrf.mxu0 }
  0xe0   : > { %v445_v49 = vadd.f32 %v2308_v45, %v444_v48  ;;  %v524_v53 = vmax.f32 %v450_v47, 0.0 }
  0xe1   : > { %v1704_v50 = vpop.f32.mrf.mxu0 }
  0xe2   : > { %v460_v51 = vadd.f32 %v1704_v50, %v2308_v45  ;;  %v523_v52 = vmax.f32 %v445_v49, 0.0 }
  0xe3   : > { %v454_v54 = vpop.f32.mrf.mxu0 }
  0xe4   : > { %v455_v55 = vadd.f32 %v2308_v45, %v454_v54  ;;  %1755 = vmatprep.mubr.f32.mxu1 %v523_v52  ;;  %v526_v56 = vmax.f32 %v460_v51, 0.0 }
  0xe5   : > { %1756 = vmatmul.mubr.f32.vlgmr.msra.gmra.mxu1 %v524_v53  ;;  %v1707_v57 = vpop.f32.mrf.mxu0 }
  0xe6   : > { %v525_v58 = vmax.f32 %v455_v55, 0.0  ;;  %v470_v59 = vadd.f32 %v1707_v57, %v2308_v45  ;;  %1827 = vmatpush3.msra.mxu1 %v730_v38 }
  0xe7   : > { %v464_v60 = vpop.f32.mrf.mxu0  ;;  %1820 = vmatprep.subr.mxu1 %v729_v39 }
  0xe8   : > { %1758 = vmatprep.mubr.f32.mxu1 %v525_v58  ;;  %v465_v61 = vadd.f32 %v2308_v45, %v464_v60  ;;  %1828 = vmatpush3.msra.mxu1 %v729_v39  ;;  %v528_v62 = vmax.f32 %v470_v59, 0.0 }
  0xe9   : > { %1759 = vmatmul.mubr.f32.gmra.mxu1 %v526_v56  ;;  %v1710_v63 = vpop.f32.mrf.mxu0  ;;  %1821 = vmatprep.subr.mxu1 %v728_v40 }
  0xea   : > { %v527_v0 = vmax.f32 %v465_v61, 0.0  ;;  %v480_v1 = vadd.f32 %v1710_v63, %v2308_v45  ;;  %1829 = vmatpush3.msra.mxu1 %v728_v40 }
  0xeb   : > { %v474_v2 = vpop.f32.mrf.mxu0  ;;  %1822 = vmatprep.subr.mxu1 %v727_v41 }
  0xec   : > { %1761 = vmatprep.mubr.f32.mxu1 %v527_v0  ;;  %v475_v3 = vadd.f32 %v2308_v45, %v474_v2  ;;  %1830 = vmatpush3.msra.mxu1 %v727_v41  ;;  %v530_v4 = vmax.f32 %v480_v1, 0.0 }
  0xed   : > { %1762 = vmatmul.mubr.f32.gmra.mxu1 %v528_v62  ;;  %v1713_v5 = vpop.f32.mrf.mxu0  ;;  %1823 = vmatprep.subr.mxu1 %v726_v42 }
  0xee   : > { %v529_v6 = vmax.f32 %v475_v3, 0.0  ;;  %v490_v7 = vadd.f32 %v1713_v5, %v2308_v45  ;;  %1831 = vmatpush3.msra.mxu1 %v726_v42 }
  0xef   : > { %v484_v8 = vpop.f32.mrf.mxu0  ;;  %1824 = vmatprep.subr.mxu1 %v725_v43 }
  0xf0   : > { %1764 = vmatprep.mubr.f32.mxu1 %v529_v6  ;;  %v485_v9 = vadd.f32 %v2308_v45, %v484_v8  ;;  %1832 = vmatpush3.msra.mxu1 %v725_v43  ;;  %v532_v10 = vmax.f32 %v490_v7, 0.0 }
  0xf1   : > { %1765 = vmatmul.mubr.f32.gmra.mxu1 %v530_v4  ;;  %v1716_v11 = vpop.f32.mrf.mxu0  ;;  %1825 = vmatprep.subr.mxu1 %v724_v44 }
  0xf2   : > { %v531_v12 = vmax.f32 %v485_v9, 0.0  ;;  %v500_v13 = vadd.f32 %v1716_v11, %v2308_v45  ;;  %1833 = vmatpush3.msra.mxu1 %v724_v44 }
  0xf3   : > { %v494_v14 = vpop.f32.mrf.mxu0  ;;  %1826 = vmatprep.subr.mxu1 %v723_v30 }
  0xf4   : > { %1767 = vmatprep.mubr.f32.mxu1 %v531_v12  ;;  %v495_v15 = vadd.f32 %v2308_v45, %v494_v14  ;;  %v534_v16 = vmax.f32 %v500_v13, 0.0  ;;  %1834 = vmatpush3.msra.mxu1 %v723_v30 }
  0xf5   : > { %1768 = vmatmul.mubr.f32.gmra.mxu1 %v532_v10  ;;  %v1719_v17 = vpop.f32.mrf.mxu0 }
  0xf6   : > { %v533_v18 = vmax.f32 %v495_v15, 0.0  ;;  %v510_v19 = vadd.f32 %v1719_v17, %v2308_v45 }
  0xf7   : > { %v504_v20 = vpop.f32.mrf.mxu0 }
  0xf8   : > { %1770 = vmatprep.mubr.f32.mxu1 %v533_v18  ;;  %v505_v21 = vadd.f32 %v2308_v45, %v504_v20  ;;  %v536_v22 = vmax.f32 %v510_v19, 0.0  ;;  %v2353_v18 = vld [vmem:[%s2849_s6] ss:$0 sm:$0xff] }
  0xf9   : > { %1771 = vmatmul.mubr.f32.gmra.mxu1 %v534_v16  ;;  %v1722_v23 = vpop.f32.mrf.mxu0  ;;  %v932_v16 = vlaneseq }
  0xfa   : > { %v535_v24 = vmax.f32 %v505_v21, 0.0  ;;  %v520_v25 = vadd.f32 %v1722_v23, %v2308_v45 }
  0xfb   : > { %v514_v26 = vpop.f32.mrf.mxu0  ;;  %v2348_v17 = vand.u32 127, %v932_v16 }
  0xfc   : > { %1773 = vmatprep.mubr.f32.mxu1 %v535_v24  ;;  %v515_v27 = vadd.f32 %v2308_v45, %v514_v26  ;;  %v538_v28 = vmax.f32 %v520_v25, 0.0 }
  0xfd   : > { %1774 = vmatmul.mubr.f32.gmra.mxu1 %v536_v22  ;;  %vm934_vm2 = vcmp.lt.s32.totalorder %v2348_v17, 24 }
  0xfe   : > { %v537_v29 = vmax.f32 %v515_v27, 0.0 }
 0x100   : > { %1776 = vmatprep.mubr.f32.mxu1 %v537_v29 }
 0x101   : > { %1777 = vmatmul.mubr.f32.gmra.mxu1 %v538_v28 }
 0x1a5   : > { %v1757_v32 = vpop.f32.mrf.mxu1 }
 0x1a6   : > { %v634_v33 = vadd.f32 %v1757_v32, %v1571_v31 }
 0x1a7   : > { %v628_v34 = vpop.f32.mrf.mxu1 }
 0x1a8   : > { %v629_v35 = vadd.f32 %v1571_v31, %v628_v34  ;;  %v708_v38 = vmax.f32 %v634_v33, 0.0 }
 0x1a9   : > { %v1760_v36 = vpop.f32.mrf.mxu1 }
 0x1aa   : > { %v707_v37 = vmax.f32 %v629_v35, 0.0  ;;  %v644_v39 = vadd.f32 %v1760_v36, %v1571_v31 }
 0x1ab   : > { %v638_v40 = vpop.f32.mrf.mxu1 }
 0x1ac   : > { %v639_v41 = vadd.f32 %v1571_v31, %v638_v40  ;;  %1795 = vmatprep.mubr.msk.f32.mxu0 %vm738_vm1, %v707_v37  ;;  %v710_v45 = vmax.f32 %v644_v39, 0.0 }
 0x1ad   : > { %1796 = vmatmul.mubr.msk.f32.vlgmr.msra.gmra.mxu0 %vm738_vm1, %v708_v38  ;;  %v1763_v42 = vpop.f32.mrf.mxu1 }
 0x1ae   : > { %v709_v43 = vmax.f32 %v639_v41, 0.0  ;;  %v654_v44 = vadd.f32 %v1763_v42, %v1571_v31 }
 0x1af   : > { %v648_v46 = vpop.f32.mrf.mxu1 }
 0x1b0   : > { %1798 = vmatprep.mubr.msk.f32.mxu0 %vm738_vm1, %v709_v43  ;;  %v649_v47 = vadd.f32 %v1571_v31, %v648_v46  ;;  %v712_v48 = vmax.f32 %v654_v44, 0.0 }
 0x1b1   : > { %1799 = vmatmul.mubr.msk.f32.gmra.mxu0 %vm738_vm1, %v710_v45  ;;  %v1766_v49 = vpop.f32.mrf.mxu1 }
 0x1b2   : > { %v711_v50 = vmax.f32 %v649_v47, 0.0  ;;  %v664_v51 = vadd.f32 %v1766_v49, %v1571_v31 }
 0x1b3   : > { %v658_v52 = vpop.f32.mrf.mxu1 }
 0x1b4   : > { %1801 = vmatprep.mubr.msk.f32.mxu0 %vm738_vm1, %v711_v50  ;;  %v659_v53 = vadd.f32 %v1571_v31, %v658_v52  ;;  %v714_v54 = vmax.f32 %v664_v51, 0.0 }
 0x1b5   : > { %1802 = vmatmul.mubr.msk.f32.gmra.mxu0 %vm738_vm1, %v712_v48  ;;  %v1769_v55 = vpop.f32.mrf.mxu1 }
 0x1b6   : > { %v713_v56 = vmax.f32 %v659_v53, 0.0  ;;  %v674_v57 = vadd.f32 %v1769_v55, %v1571_v31 }
 0x1b7   : > { %v668_v58 = vpop.f32.mrf.mxu1 }
 0x1b8   : > { %1804 = vmatprep.mubr.msk.f32.mxu0 %vm738_vm1, %v713_v56  ;;  %v669_v59 = vadd.f32 %v1571_v31, %v668_v58  ;;  %v716_v60 = vmax.f32 %v674_v57, 0.0 }
 0x1b9   : > { %1805 = vmatmul.mubr.msk.f32.gmra.mxu0 %vm738_vm1, %v714_v54  ;;  %v1772_v61 = vpop.f32.mrf.mxu1 }
 0x1ba   : > { %v715_v62 = vmax.f32 %v669_v59, 0.0  ;;  %v684_v63 = vadd.f32 %v1772_v61, %v1571_v31 }
 0x1bb   : > { %v678_v0 = vpop.f32.mrf.mxu1 }
 0x1bc   : > { %1807 = vmatprep.mubr.msk.f32.mxu0 %vm738_vm1, %v715_v62  ;;  %v679_v1 = vadd.f32 %v1571_v31, %v678_v0  ;;  %v718_v2 = vmax.f32 %v684_v63, 0.0 }
 0x1bd   : > { %1808 = vmatmul.mubr.msk.f32.gmra.mxu0 %vm738_vm1, %v716_v60  ;;  %v1775_v3 = vpop.f32.mrf.mxu1 }
 0x1be   : > { %v717_v4 = vmax.f32 %v679_v1, 0.0  ;;  %v694_v5 = vadd.f32 %v1775_v3, %v1571_v31 }
 0x1bf   : > { %v688_v6 = vpop.f32.mrf.mxu1 }
 0x1c0   : > { %1810 = vmatprep.mubr.msk.f32.mxu0 %vm738_vm1, %v717_v4  ;;  %v689_v7 = vadd.f32 %v1571_v31, %v688_v6  ;;  %v720_v8 = vmax.f32 %v694_v5, 0.0 }
 0x1c1   : > { %1811 = vmatmul.mubr.msk.f32.gmra.mxu0 %vm738_vm1, %v718_v2  ;;  %v1778_v9 = vpop.f32.mrf.mxu1 }
 0x1c2   : > { %v719_v10 = vmax.f32 %v689_v7, 0.0  ;;  %v704_v11 = vadd.f32 %v1778_v9, %v1571_v31 }
 0x1c3   : > { %v698_v12 = vpop.f32.mrf.mxu1 }
 0x1c4   : > { %1813 = vmatprep.mubr.msk.f32.mxu0 %vm738_vm1, %v719_v10  ;;  %v699_v13 = vadd.f32 %v1571_v31, %v698_v12  ;;  %v722_v14 = vmax.f32 %v704_v11, 0.0 }
 0x1c5   : > { %1814 = vmatmul.mubr.msk.f32.gmra.mxu0 %vm738_vm1, %v720_v8 }
 0x1c6   : > { %v721_v15 = vmax.f32 %v699_v13, 0.0 }
 0x1c8   : > { %1816 = vmatprep.mubr.msk.f32.mxu1 %vm738_vm1, %v721_v15 }
 0x1c9   : > { %1817 = vmatmul.mubr.msk.f32.vlgmr.msra.gmra.mxu1 %vm738_vm1, %v722_v14 }
 0x26d   : > { %v1797_v19 = vpop.f32.mrf.mxu0 }
 0x26e   : > { %v2357_v20 = vadd.f32 %v1797_v19, %v2353_v18 }
 0x26f   : > { %v853_v21 = vpop.f32.mrf.mxu0 }
 0x270   : > { %v2360_v22 = vadd.f32 %v2353_v18, %v853_v21  ;;  %v984_v23 = vsel %vm934_vm2, -1e+30, %v2357_v20  ;;  %v936_v24 = vsel %vm934_vm2, %v2357_v20, -1e+30 }
 0x271   : > { %1001 = vmax.xlane.f32.xlu1 %v984_v23  ;;  %953 = vmax.xlane.f32.xlu0 %v936_v24  ;;  %v1800_v25 = vpop.f32.mrf.mxu0 }
 0x272   : > { %v2369_v26 = vadd.f32 %v1800_v25, %v2353_v18  ;;  %v935_v29 = vsel %vm934_vm2, %v2360_v22, -1e+30  ;;  %v983_v33 = vsel %vm934_vm2, -1e+30, %v2360_v22 }
 0x273   : > { %v863_v27 = vpop.f32.mrf.mxu0 }
 0x274   : > { %v938_v28 = vsel %vm934_vm2, %v2369_v26, -1e+30  ;;  %v2378_v31 = vadd.f32 %v2353_v18, %v863_v27  ;;  %v986_v32 = vsel %vm934_vm2, -1e+30, %v2369_v26 }
 0x275   : > { %957 = vmax.xlane.f32.xlu1 %v938_v28  ;;  %951 = vmax.xlane.f32.xlu0 %v935_v29  ;;  %v1803_v30 = vpop.f32.mrf.mxu0 }
 0x276   : > { %v2387_v35 = vadd.f32 %v1803_v30, %v2353_v18  ;;  %v937_v37 = vsel %vm934_vm2, %v2378_v31, -1e+30  ;;  %v985_v38 = vsel %vm934_vm2, -1e+30, %v2378_v31 }
 0x277   : > { %v873_v34 = vpop.f32.mrf.mxu0 }
 0x278   : > { %v2390_v36 = vadd.f32 %v2353_v18, %v873_v34  ;;  %v940_v40 = vsel %vm934_vm2, %v2387_v35, -1e+30  ;;  %v988_v45 = vsel %vm934_vm2, -1e+30, %v2387_v35 }
 0x279   : > { %1005 = vmax.xlane.f32.xlu1 %v986_v32  ;;  %999 = vmax.xlane.f32.xlu0 %v983_v33  ;;  %v1806_v39 = vpop.f32.mrf.mxu0 }
 0x27a   : > { %v939_v41 = vsel %vm934_vm2, %v2390_v36, -1e+30  ;;  %v2405_v43 = vadd.f32 %v1806_v39, %v2353_v18  ;;  %v987_v46 = vsel %vm934_vm2, -1e+30, %v2390_v36 }
 0x27b   : > { %v883_v42 = vpop.f32.mrf.mxu0 }
 0x27c   : > { %v2408_v44 = vadd.f32 %v2353_v18, %v883_v42  ;;  %v942_v48 = vsel %vm934_vm2, %v2405_v43, -1e+30  ;;  %v990_v53 = vsel %vm934_vm2, -1e+30, %v2405_v43 }
 0x27d   : > { %955 = vmax.xlane.f32.xlu1 %v937_v37  ;;  %1003 = vmax.xlane.f32.xlu0 %v985_v38  ;;  %v1809_v47 = vpop.f32.mrf.mxu0 }
 0x27e   : > { %v941_v49 = vsel %vm934_vm2, %v2408_v44, -1e+30  ;;  %v2423_v51 = vadd.f32 %v1809_v47, %v2353_v18  ;;  %v989_v54 = vsel %vm934_vm2, -1e+30, %v2408_v44 }
 0x27f   : > { %v893_v50 = vpop.f32.mrf.mxu0 }
 0x280   : > { %v2426_v52 = vadd.f32 %v2353_v18, %v893_v50  ;;  %v944_v56 = vsel %vm934_vm2, %v2423_v51, -1e+30  ;;  %v992_v61 = vsel %vm934_vm2, -1e+30, %v2423_v51 }
 0x281   : > { %961 = vmax.xlane.f32.xlu1 %v940_v40  ;;  %959 = vmax.xlane.f32.xlu0 %v939_v41  ;;  %v1812_v55 = vpop.f32.mrf.mxu0 }
 0x282   : > { %v943_v57 = vsel %vm934_vm2, %v2426_v52, -1e+30  ;;  %v2441_v59 = vadd.f32 %v1812_v55, %v2353_v18  ;;  %v991_v62 = vsel %vm934_vm2, -1e+30, %v2426_v52 }
 0x283   : > { %v903_v58 = vpop.f32.mrf.mxu0 }
 0x284   : > { %v2444_v60 = vadd.f32 %v2353_v18, %v903_v58  ;;  %v946_v0 = vsel %vm934_vm2, %v2441_v59, -1e+30  ;;  %v994_v5 = vsel %vm934_vm2, -1e+30, %v2441_v59 }
 0x285   : > { %1009 = vmax.xlane.f32.xlu1 %v988_v45  ;;  %1007 = vmax.xlane.f32.xlu0 %v987_v46  ;;  %v1815_v63 = vpop.f32.mrf.mxu0 }
 0x286   : > { %v945_v1 = vsel %vm934_vm2, %v2444_v60, -1e+30  ;;  %v2459_v3 = vadd.f32 %v1815_v63, %v2353_v18  ;;  %v993_v6 = vsel %vm934_vm2, -1e+30, %v2444_v60 }
 0x287   : > { %v913_v2 = vpop.f32.mrf.mxu0 }
 0x288   : > { %v2462_v4 = vadd.f32 %v2353_v18, %v913_v2  ;;  %v948_v8 = vsel %vm934_vm2, %v2459_v3, -1e+30  ;;  %v996_v13 = vsel %vm934_vm2, -1e+30, %v2459_v3 }
 0x289   : > { %965 = vmax.xlane.f32.xlu1 %v942_v48  ;;  %963 = vmax.xlane.f32.xlu0 %v941_v49  ;;  %v1818_v7 = vpop.f32.mrf.mxu1 }
 0x28a   : > { %v947_v9 = vsel %vm934_vm2, %v2462_v4, -1e+30  ;;  %v2477_v11 = vadd.f32 %v1818_v7, %v2353_v18  ;;  %v995_v14 = vsel %vm934_vm2, -1e+30, %v2462_v4 }
 0x28b   : > { %v923_v10 = vpop.f32.mrf.mxu1 }
 0x28c   : > { %v2480_v12 = vadd.f32 %v2353_v18, %v923_v10  ;;  %v950_v15 = vsel %vm934_vm2, %v2477_v11, -1e+30  ;;  %v998_v18 = vsel %vm934_vm2, -1e+30, %v2477_v11 }
 0x28d   : > { %1013 = vmax.xlane.f32.xlu1 %v990_v53  ;;  %1011 = vmax.xlane.f32.xlu0 %v989_v54 }
 0x28e   : > { %v949_v16 = vsel %vm934_vm2, %v2480_v12, -1e+30  ;;  %v997_v19 = vsel %vm934_vm2, -1e+30, %v2480_v12 }
 0x291   : > { %969 = vmax.xlane.f32.xlu1 %v944_v56  ;;  %967 = vmax.xlane.f32.xlu0 %v943_v57 }
 0x295   : > { %1017 = vmax.xlane.f32.xlu1 %v992_v61  ;;  %1015 = vmax.xlane.f32.xlu0 %v991_v62 }
 0x299   : > { %973 = vmax.xlane.f32.xlu1 %v946_v0  ;;  %971 = vmax.xlane.f32.xlu0 %v945_v1 }
 0x29d   : > { %1021 = vmax.xlane.f32.xlu1 %v994_v5  ;;  %1019 = vmax.xlane.f32.xlu0 %v993_v6 }
 0x2a1   : > { %977 = vmax.xlane.f32.xlu1 %v948_v8  ;;  %975 = vmax.xlane.f32.xlu0 %v947_v9 }
 0x2a5   : > { %1025 = vmax.xlane.f32.xlu1 %v996_v13  ;;  %1023 = vmax.xlane.f32.xlu0 %v995_v14 }
 0x2a9   : > { %981 = vmax.xlane.f32.xlu1 %v950_v15  ;;  %979 = vmax.xlane.f32.xlu0 %v949_v16 }
 0x2ad   : > { %1029 = vmax.xlane.f32.xlu1 %v998_v18  ;;  %1027 = vmax.xlane.f32.xlu0 %v997_v19 }
 0x2fa   : > { %v1002_v21 = vpop.xlane.xlu1 %1001  ;;  %v954_v23 = vpop.xlane.xlu0 %953 }
 0x2fb   : > { %v1032_v24 = vsel %vm934_vm2, %v954_v23, %v1002_v21 }
 0x2fc   : > { %v1048_v25 = vsub.f32 %v2357_v20, %v1032_v24 }
 0x2fe   : > { %v1065_v27 = vmul.f32 1.442695, %v1048_v25  ;;  %v958_v28 = vpop.xlane.xlu1 %957  ;;  %v952_v29 = vpop.xlane.xlu0 %951 }
 0x300   : > { %1923 = vpow2.f32 %v1065_v27 }
 0x302   : > { %v1006_v30 = vpop.xlane.xlu1 %1005  ;;  %v1000_v32 = vpop.xlane.xlu0 %999 }
 0x303   : > { %v1034_v33 = vsel %vm934_vm2, %v958_v28, %v1006_v30  ;;  %v1031_v34 = vsel %vm934_vm2, %v952_v29, %v1000_v32 }
 0x304   : > { %v1050_v37 = vsub.f32 %v2369_v26, %v1034_v33  ;;  %v1047_v38 = vsub.f32 %v2360_v22, %v1031_v34 }
 0x306   : > { %v1069_v39 = vmul.f32 1.442695, %v1050_v37  ;;  %v1063_v40 = vmul.f32 1.442695, %v1047_v38  ;;  %v956_v41 = vpop.xlane.xlu1 %955  ;;  %v1004_v20 = vpop.xlane.xlu0 %1003 }
 0x307   : > { %v1033_v42 = vsel %vm934_vm2, %v956_v41, %v1004_v20 }
 0x308   : > { %1925 = vpow2.f32 %v1069_v39  ;;  %v1049_v45 = vsub.f32 %v2378_v31, %v1033_v42 }
 0x309   : > { %1927 = vpow2.f32 %v1063_v40 }
 0x30a   : > { %v962_v46 = vpop.xlane.xlu1 %961  ;;  %v960_v47 = vpop.xlane.xlu0 %959  ;;  %v1067_v48 = vmul.f32 1.442695, %v1049_v45 }
 0x30c   : > { %1929 = vpow2.f32 %v1067_v48 }
 0x30d   : > { %v2512_v49 = vpop.eup %1923 }
 0x30e   : > { %v1010_v50 = vpop.xlane.xlu1 %1009  ;;  %v1008_v26 = vpop.xlane.xlu0 %1007  ;;  %v1096_v22 = vsel %vm934_vm2, %v2512_v49, 0.0  ;;  %v1144_v61 = vsel %vm934_vm2, 0.0, %v2512_v49 }
 0x30f   : > { %v1036_v53 = vsel %vm934_vm2, %v962_v46, %v1010_v50  ;;  %v1035_v54 = vsel %vm934_vm2, %v960_v47, %v1008_v26  ;;  %1113 = vadd.xlane.f32.xlu1 %v1096_v22 }
 0x310   : > { %v1052_v31 = vsub.f32 %v2387_v35, %v1036_v53  ;;  %v1051_v55 = vsub.f32 %v2390_v36, %v1035_v54 }
 0x312   : > { %v1073_v56 = vmul.f32 1.442695, %v1052_v31  ;;  %v966_v57 = vpop.xlane.xlu1 %965  ;;  %v964_v58 = vpop.xlane.xlu0 %963  ;;  %v1071_v62 = vmul.f32 1.442695, %v1051_v55 }
 0x313   : > { %1161 = vadd.xlane.f32.xlu1 %v1144_v61 }
 0x314   : > { %1931 = vpow2.f32 %v1073_v56 }
 0x315   : > { %v2526_v63 = vpop.eup %1925  ;;  %1933 = vpow2.f32 %v1071_v62 }
 0x316   : > { %v2528_v0 = vpop.eup %1927  ;;  %v1014_v1 = vpop.xlane.xlu1 %1013  ;;  %v1098_v35 = vsel %vm934_vm2, %v2526_v63, 0.0  ;;  %v1146_v14 = vsel %vm934_vm2, 0.0, %v2526_v63 }
 0x317   : > { %v1012_v2 = vpop.xlane.xlu0 %1011  ;;  %v1038_v36 = vsel %vm934_vm2, %v966_v57, %v1014_v1  ;;  %1117 = vadd.xlane.f32.xlu1 %v1098_v35  ;;  %v1095_v6 = vsel %vm934_vm2, %v2528_v0, 0.0  ;;  %v1143_v16 = vsel %vm934_vm2, 0.0, %v2528_v0 }
 0x318   : > { %v1037_v5 = vsel %vm934_vm2, %v964_v58, %v1012_v2  ;;  %v1054_v7 = vsub.f32 %v2405_v43, %v1038_v36  ;;  %1111 = vadd.xlane.f32.xlu0 %v1095_v6 }
 0x319   : > { %v1053_v8 = vsub.f32 %v2408_v44, %v1037_v5  ;;  %v2548_v18 = vpop.eup %1929 }
 0x31a   : > { %v1077_v9 = vmul.f32 1.442695, %v1054_v7  ;;  %v970_v10 = vpop.xlane.xlu1 %969  ;;  %v1097_v23 = vsel %vm934_vm2, %v2548_v18, 0.0  ;;  %v1145_v34 = vsel %vm934_vm2, 0.0, %v2548_v18 }
 0x31b   : > { %v968_v13 = vpop.xlane.xlu0 %967  ;;  %v1075_v15 = vmul.f32 1.442695, %v1053_v8  ;;  %1165 = vadd.xlane.f32.xlu1 %v1146_v14 }
 0x31c   : > { %1935 = vpow2.f32 %v1077_v9  ;;  %1159 = vadd.xlane.f32.xlu0 %v1143_v16 }
 0x31d   : > { %1937 = vpow2.f32 %v1075_v15 }
 0x31e   : > { %v1018_v43 = vpop.xlane.xlu1 %1017 }
 0x31f   : > { %v1016_v44 = vpop.xlane.xlu0 %1015  ;;  %v1040_v19 = vsel %vm934_vm2, %v970_v10, %v1018_v43 }
 0x320   : > { %v1039_v21 = vsel %vm934_vm2, %v968_v13, %v1016_v44  ;;  %v1056_v24 = vsub.f32 %v2423_v51, %v1040_v19  ;;  %1115 = vadd.xlane.f32.xlu0 %v1097_v23 }
 0x321   : > { %v1055_v25 = vsub.f32 %v2426_v52, %v1039_v21  ;;  %v2559_v27 = vpop.eup %1931 }
 0x322   : > { %v1081_v28 = vmul.f32 1.442695, %v1056_v24  ;;  %v974_v29 = vpop.xlane.xlu1 %973  ;;  %v1100_v32 = vsel %vm934_vm2, %v2559_v27, 0.0  ;;  %v2567_v37 = vpop.eup %1933  ;;  %v1148_v38 = vsel %vm934_vm2, 0.0, %v2559_v27 }
 0x323   : > { %v972_v30 = vpop.xlane.xlu0 %971  ;;  %v1079_v33 = vmul.f32 1.442695, %v1055_v25  ;;  %1121 = vadd.xlane.f32.xlu1 %v1100_v32  ;;  %v1099_v41 = vsel %vm934_vm2, %v2567_v37, 0.0  ;;  %v1147_v22 = vsel %vm934_vm2, 0.0, %v2567_v37 }
 0x324   : > { %1939 = vpow2.f32 %v1081_v28  ;;  %1163 = vadd.xlane.f32.xlu0 %v1145_v34 }
 0x325   : > { %1941 = vpow2.f32 %v1079_v33 }
 0x326   : > { %v1022_v51 = vpop.xlane.xlu1 %1021 }
 0x327   : > { %v1020_v52 = vpop.xlane.xlu0 %1019  ;;  %v1042_v39 = vsel %vm934_vm2, %v974_v29, %v1022_v51  ;;  %1169 = vadd.xlane.f32.xlu1 %v1148_v38 }
 0x328   : > { %v1041_v40 = vsel %vm934_vm2, %v972_v30, %v1020_v52  ;;  %v1058_v20 = vsub.f32 %v2441_v59, %v1042_v39  ;;  %1119 = vadd.xlane.f32.xlu0 %v1099_v41 }
 0x329   : > { %v1057_v42 = vsub.f32 %v2444_v60, %v1041_v40  ;;  %v2581_v45 = vpop.eup %1935 }
 0x32a   : > { %v1085_v46 = vmul.f32 1.442695, %v1058_v20  ;;  %v978_v47 = vpop.xlane.xlu1 %977  ;;  %v1102_v50 = vsel %vm934_vm2, %v2581_v45, 0.0  ;;  %v2589_v53 = vpop.eup %1937  ;;  %v1150_v54 = vsel %vm934_vm2, 0.0, %v2581_v45 }
 0x32b   : > { %v976_v48 = vpop.xlane.xlu0 %975  ;;  %v1083_v26 = vmul.f32 1.442695, %v1057_v42  ;;  %1125 = vadd.xlane.f32.xlu1 %v1102_v50  ;;  %v1101_v56 = vsel %vm934_vm2, %v2589_v53, 0.0  ;;  %v1149_v5 = vsel %vm934_vm2, 0.0, %v2589_v53 }
 0x32c   : > { %1943 = vpow2.f32 %v1085_v46  ;;  %1167 = vadd.xlane.f32.xlu0 %v1147_v22 }
 0x32d   : > { %1945 = vpow2.f32 %v1083_v26 }
 0x32e   : > { %v1026_v59 = vpop.xlane.xlu1 %1025 }
 0x32f   : > { %v1024_v60 = vpop.xlane.xlu0 %1023  ;;  %v1044_v31 = vsel %vm934_vm2, %v978_v47, %v1026_v59  ;;  %1173 = vadd.xlane.f32.xlu1 %v1150_v54 }
 0x330   : > { %v1043_v55 = vsel %vm934_vm2, %v976_v48, %v1024_v60  ;;  %v1060_v57 = vsub.f32 %v2459_v3, %v1044_v31  ;;  %1123 = vadd.xlane.f32.xlu0 %v1101_v56 }
 0x331   : > { %v1059_v58 = vsub.f32 %v2462_v4, %v1043_v55  ;;  %v2603_v61 = vpop.eup %1939 }
 0x332   : > { %v1089_v62 = vmul.f32 1.442695, %v1060_v57  ;;  %v982_v1 = vpop.xlane.xlu1 %981  ;;  %v1104_v35 = vsel %vm934_vm2, %v2603_v61, 0.0  ;;  %v2611_v6 = vpop.eup %1941  ;;  %v1152_v7 = vsel %vm934_vm2, 0.0, %v2603_v61 }
 0x333   : > { %v980_v2 = vpop.xlane.xlu0 %979  ;;  %v1087_v36 = vmul.f32 1.442695, %v1059_v58  ;;  %1129 = vadd.xlane.f32.xlu1 %v1104_v35  ;;  %v1103_v10 = vsel %vm934_vm2, %v2611_v6, 0.0  ;;  %v1151_v19 = vsel %vm934_vm2, 0.0, %v2611_v6 }
 0x334   : > { %1947 = vpow2.f32 %v1089_v62  ;;  %1171 = vadd.xlane.f32.xlu0 %v1149_v5 }
 0x335   : > { %1949 = vpow2.f32 %v1087_v36 }
 0x336   : > { %v1030_v3 = vpop.xlane.xlu1 %1029 }
 0x337   : > { %v1028_v4 = vpop.xlane.xlu0 %1027  ;;  %v1046_v8 = vsel %vm934_vm2, %v982_v1, %v1030_v3  ;;  %1177 = vadd.xlane.f32.xlu1 %v1152_v7 }
 0x338   : > { %v1045_v9 = vsel %vm934_vm2, %v980_v2, %v1028_v4  ;;  %v1062_v13 = vsub.f32 %v2477_v11, %v1046_v8  ;;  %1127 = vadd.xlane.f32.xlu0 %v1103_v10 }
 0x339   : > { %v1061_v14 = vsub.f32 %v2480_v12, %v1045_v9  ;;  %v2625_v15 = vpop.eup %1943 }
 0x33a   : > { %v1093_v16 = vmul.f32 1.442695, %v1062_v13  ;;  %v1106_v43 = vsel %vm934_vm2, %v2625_v15, 0.0  ;;  %v2633_v21 = vpop.eup %1945  ;;  %v1154_v11 = vsel %vm934_vm2, 0.0, %v2625_v15 }
 0x33b   : > { %v1091_v44 = vmul.f32 1.442695, %v1061_v14  ;;  %1133 = vadd.xlane.f32.xlu1 %v1106_v43  ;;  %v1105_v12 = vsel %vm934_vm2, %v2633_v21, 0.0  ;;  %v1153_v25 = vsel %vm934_vm2, 0.0, %v2633_v21 }
 0x33c   : > { %1951 = vpow2.f32 %v1093_v16  ;;  %1175 = vadd.xlane.f32.xlu0 %v1151_v19 }
 0x33d   : > { %1953 = vpow2.f32 %v1091_v44 }
 0x33f   : > { %1181 = vadd.xlane.f32.xlu1 %v1154_v11 }
 0x340   : > { %1131 = vadd.xlane.f32.xlu0 %v1105_v12 }
 0x341   : > { %v2641_v23 = vpop.eup %1947 }
 0x342   : > { %v1108_v24 = vsel %vm934_vm2, %v2641_v23, 0.0  ;;  %v2649_v28 = vpop.eup %1949  ;;  %v1156_v29 = vsel %vm934_vm2, 0.0, %v2641_v23 }
 0x343   : > { %1137 = vadd.xlane.f32.xlu1 %v1108_v24  ;;  %v1107_v30 = vsel %vm934_vm2, %v2649_v28, 0.0  ;;  %v1155_v34 = vsel %vm934_vm2, 0.0, %v2649_v28 }
 0x344   : > { %1179 = vadd.xlane.f32.xlu0 %v1153_v25 }
 0x347   : > { %1185 = vadd.xlane.f32.xlu1 %v1156_v29 }
 0x348   : > { %1135 = vadd.xlane.f32.xlu0 %v1107_v30 }
 0x349   : > { %v2657_v32 = vpop.eup %1951 }
 0x34a   : > { %v1110_v33 = vsel %vm934_vm2, %v2657_v32, 0.0  ;;  %v2665_v51 = vpop.eup %1953  ;;  %v1158_v52 = vsel %vm934_vm2, 0.0, %v2657_v32 }
 0x34b   : > { %1141 = vadd.xlane.f32.xlu1 %v1110_v33  ;;  %v1109_v38 = vsel %vm934_vm2, %v2665_v51, 0.0  ;;  %v1157_v39 = vsel %vm934_vm2, 0.0, %v2665_v51 }
 0x34c   : > { %1183 = vadd.xlane.f32.xlu0 %v1155_v34 }
 0x34f   : > { %1189 = vadd.xlane.f32.xlu1 %v1158_v52 }
 0x350   : > { %1139 = vadd.xlane.f32.xlu0 %v1109_v38 }
 0x354   : > { %1187 = vadd.xlane.f32.xlu0 %v1157_v39 }
 0x398   : > { %v1114_v40 = vpop.xlane.xlu1 %1113 }
 0x399   : > { %1955 = vrcp.f32 %v1114_v40 }
 0x39c   : > { %v1162_v41 = vpop.xlane.xlu1 %1161 }
 0x39d   : > { %1957 = vrcp.f32 %v1162_v41 }
 0x3a0   : > { %v1118_v20 = vpop.xlane.xlu1 %1117 }
 0x3a1   : > { %v1112_v42 = vpop.xlane.xlu0 %1111  ;;  %1959 = vrcp.f32 %v1118_v20 }
 0x3a2   : > { %1961 = vrcp.f32 %v1112_v42 }
 0x3a4   : > { %v1166_v46 = vpop.xlane.xlu1 %1165 }
 0x3a5   : > { %1963 = vrcp.f32 %v1166_v46  ;;  %v1160_v47 = vpop.xlane.xlu0 %1159 }
 0x3a6   : > { %1965 = vrcp.f32 %v1160_v47  ;;  %v1956_v48 = vpop.eup %1955 }
 0x3a9   : > { %v1116_v50 = vpop.xlane.xlu0 %1115 }
 0x3aa   : > { %v1958_v26 = vpop.eup %1957  ;;  %1967 = vrcp.f32 %v1116_v50 }
 0x3ab   : > { %v1224_v22 = vsel %vm934_vm2, %v1956_v48, %v1958_v26 }
 0x3ac   : > { %v1240_v59 = vmul.f32 %v2512_v49, %v1224_v22  ;;  %v1122_v60 = vpop.xlane.xlu1 %1121 }
 0x3ad   : > { %v1164_v54 = vpop.xlane.xlu0 %1163 }
 0x3ae   : > { %1256 = vst [vmem:[%s2680_s21 + $0x8] sm:$0xff] %v1240_v59  ;;  %1969 = vrcp.f32 %v1164_v54  ;;  %v1960_v31 = vpop.eup %1959 }
 0x3af   : > { %1971 = vrcp.f32 %v1122_v60  ;;  %v1962_v56 = vpop.eup %1961 }
 0x3b0   : > { %v1170_v55 = vpop.xlane.xlu1 %1169 }
 0x3b1   : > { %1973 = vrcp.f32 %v1170_v55  ;;  %v1120_v57 = vpop.xlane.xlu0 %1119 }
 0x3b2   : > { %v1964_v58 = vpop.eup %1963  ;;  %1975 = vrcp.f32 %v1120_v57 }
 0x3b3   : > { %v1966_v62 = vpop.eup %1965  ;;  %v1226_v49 = vsel %vm934_vm2, %v1960_v31, %v1964_v58 }
 0x3b4   : > { %v1242_v1 = vmul.f32 %v2526_v63, %v1226_v49  ;;  %v1223_v2 = vsel %vm934_vm2, %v1962_v56, %v1966_v62  ;;  %v1126_v35 = vpop.xlane.xlu1 %1125 }
 0x3b5   : > { %v1239_v36 = vmul.f32 %v2528_v0, %v1223_v2  ;;  %v1168_v5 = vpop.xlane.xlu0 %1167 }
 0x3b6   : > { %1258 = vst [vmem:[%s2680_s21 + $0x18] sm:$0xff] %v1242_v1  ;;  %1977 = vrcp.f32 %v1168_v5 }
 0x3b7   : > { %1255 = vst [vmem:[%s2680_s21] sm:$0xff] %v1239_v36  ;;  %1979 = vrcp.f32 %v1126_v35  ;;  %v1968_v7 = vpop.eup %1967 }
 0x3b8   : > { %v1174_v3 = vpop.xlane.xlu1 %1173 }
 0x3b9   : > { %1981 = vrcp.f32 %v1174_v3  ;;  %v1124_v4 = vpop.xlane.xlu0 %1123 }
 0x3ba   : > { %1983 = vrcp.f32 %v1124_v4 }
 0x3bb   : > { %v1970_v8 = vpop.eup %1969 }
 0x3bc   : > { %v1225_v63 = vsel %vm934_vm2, %v1968_v7, %v1970_v8  ;;  %v1130_v9 = vpop.xlane.xlu1 %1129  ;;  %v1972_v10 = vpop.eup %1971 }
 0x3bd   : > { %v1241_v0 = vmul.f32 %v2548_v18, %v1225_v63  ;;  %v1172_v13 = vpop.xlane.xlu0 %1171 }
 0x3be   : > { %v1974_v14 = vpop.eup %1973  ;;  %1985 = vrcp.f32 %v1172_v13 }
 0x3bf   : > { %1257 = vst [vmem:[%s2680_s21 + $0x10] sm:$0xff] %v1241_v0  ;;  %v1228_v16 = vsel %vm934_vm2, %v1972_v10, %v1974_v14  ;;  %1987 = vrcp.f32 %v1130_v9  ;;  %v1976_v11 = vpop.eup %1975 }
 0x3c0   : > { %v1244_v43 = vmul.f32 %v2559_v27, %v1228_v16  ;;  %v1178_v44 = vpop.xlane.xlu1 %1177 }
 0x3c1   : > { %1989 = vrcp.f32 %v1178_v44  ;;  %v1128_v19 = vpop.xlane.xlu0 %1127 }
 0x3c2   : > { %1260 = vst [vmem:[%s2680_s21 + $0x28] sm:$0xff] %v1244_v43  ;;  %1991 = vrcp.f32 %v1128_v19 }
 0x3c3   : > { %v1978_v12 = vpop.eup %1977 }
 0x3c4   : > { %v1227_v18 = vsel %vm934_vm2, %v1976_v11, %v1978_v12  ;;  %v1134_v24 = vpop.xlane.xlu1 %1133  ;;  %v1980_v25 = vpop.eup %1979 }
 0x3c5   : > { %v1243_v29 = vmul.f32 %v2567_v37, %v1227_v18  ;;  %v1176_v30 = vpop.xlane.xlu0 %1175 }
 0x3c6   : > { %v1982_v33 = vpop.eup %1981  ;;  %1993 = vrcp.f32 %v1176_v30 }
 0x3c7   : > { %1259 = vst [vmem:[%s2680_s21 + $0x20] sm:$0xff] %v1243_v29  ;;  %v1230_v27 = vsel %vm934_vm2, %v1980_v25, %v1982_v33  ;;  %1995 = vrcp.f32 %v1134_v24  ;;  %v1984_v39 = vpop.eup %1983 }
 0x3c8   : > { %v1246_v34 = vmul.f32 %v2581_v45, %v1230_v27  ;;  %v1182_v52 = vpop.xlane.xlu1 %1181 }
 0x3c9   : > { %1997 = vrcp.f32 %v1182_v52  ;;  %v1132_v38 = vpop.xlane.xlu0 %1131 }
 0x3ca   : > { %1262 = vst [vmem:[%s2680_s21 + $0x38] sm:$0xff] %v1246_v34  ;;  %1999 = vrcp.f32 %v1132_v38 }
 0x3cb   : > { %v1986_v40 = vpop.eup %1985 }
 0x3cc   : > { %v1229_v37 = vsel %vm934_vm2, %v1984_v39, %v1986_v40  ;;  %v1138_v41 = vpop.xlane.xlu1 %1137  ;;  %v1988_v20 = vpop.eup %1987 }
 0x3cd   : > { %v1245_v42 = vmul.f32 %v2589_v53, %v1229_v37  ;;  %v1180_v46 = vpop.xlane.xlu0 %1179 }
 0x3ce   : > { %v1990_v47 = vpop.eup %1989  ;;  %2001 = vrcp.f32 %v1180_v46 }
 0x3cf   : > { %1261 = vst [vmem:[%s2680_s21 + $0x30] sm:$0xff] %v1245_v42  ;;  %v1232_v45 = vsel %vm934_vm2, %v1988_v20, %v1990_v47  ;;  %2003 = vrcp.f32 %v1138_v41  ;;  %v1992_v22 = vpop.eup %1991 }
 0x3d0   : > { %v1248_v48 = vmul.f32 %v2603_v61, %v1232_v45  ;;  %v1186_v50 = vpop.xlane.xlu1 %1185 }
 0x3d1   : > { %2005 = vrcp.f32 %v1186_v50  ;;  %v1136_v26 = vpop.xlane.xlu0 %1135 }
 0x3d2   : > { %1264 = vst [vmem:[%s2680_s21 + $0x48] sm:$0xff] %v1248_v48  ;;  %2007 = vrcp.f32 %v1136_v26 }
 0x3d3   : > { %v1994_v59 = vpop.eup %1993 }
 0x3d4   : > { %v1231_v53 = vsel %vm934_vm2, %v1992_v22, %v1994_v59  ;;  %v1142_v60 = vpop.xlane.xlu1 %1141  ;;  %v1996_v54 = vpop.eup %1995 }
 0x3d5   : > { %v1247_v31 = vmul.f32 %v2611_v6, %v1231_v53  ;;  %v1184_v55 = vpop.xlane.xlu0 %1183 }
 0x3d6   : > { %v1998_v56 = vpop.eup %1997  ;;  %2009 = vrcp.f32 %v1184_v55 }
 0x3d7   : > { %1263 = vst [vmem:[%s2680_s21 + $0x40] sm:$0xff] %v1247_v31  ;;  %v1234_v61 = vsel %vm934_vm2, %v1996_v54, %v1998_v56  ;;  %2011 = vrcp.f32 %v1142_v60  ;;  %v2000_v49 = vpop.eup %1999 }
 0x3d8   : > { %v1250_v57 = vmul.f32 %v2625_v15, %v1234_v61  ;;  %v1190_v58 = vpop.xlane.xlu1 %1189 }
 0x3d9   : > { %2013 = vrcp.f32 %v1190_v58  ;;  %v1140_v62 = vpop.xlane.xlu0 %1139 }
 0x3da   : > { %1266 = vst [vmem:[%s2680_s21 + $0x58] sm:$0xff] %v1250_v57  ;;  %2015 = vrcp.f32 %v1140_v62 }
 0x3db   : > { %v2002_v1 = vpop.eup %2001 }
 0x3dc   : > { %v1233_v6 = vsel %vm934_vm2, %v2000_v49, %v2002_v1  ;;  %v2004_v2 = vpop.eup %2003 }
 0x3dd   : > { %v1249_v35 = vmul.f32 %v2633_v21, %v1233_v6  ;;  %v1188_v36 = vpop.xlane.xlu0 %1187 }
 0x3de   : > { %v2006_v5 = vpop.eup %2005  ;;  %2017 = vrcp.f32 %v1188_v36 }
 0x3df   : > { %1265 = vst [vmem:[%s2680_s21 + $0x50] sm:$0xff] %v1249_v35  ;;  %v1236_v15 = vsel %vm934_vm2, %v2004_v2, %v2006_v5  ;;  %v2008_v4 = vpop.eup %2007 }
 0x3e0   : > { %v1252_v3 = vmul.f32 %v2641_v23, %v1236_v15 }
 0x3e2   : > { %1268 = vst [vmem:[%s2680_s21 + $0x68] sm:$0xff] %v1252_v3 }
 0x3e3   : > { %v2010_v7 = vpop.eup %2009 }
 0x3e4   : > { %v1235_v8 = vsel %vm934_vm2, %v2008_v4, %v2010_v7  ;;  %v2012_v63 = vpop.eup %2011 }
 0x3e5   : > { %v1251_v21 = vmul.f32 %v2649_v28, %v1235_v8 }
 0x3e6   : > { %v2014_v9 = vpop.eup %2013 }
 0x3e7   : > { %1267 = vst [vmem:[%s2680_s21 + $0x60] sm:$0xff] %v1251_v21  ;;  %v1238_v10 = vsel %vm934_vm2, %v2012_v63, %v2014_v9  ;;  %v2016_v13 = vpop.eup %2015 }
 0x3e8   : > { %v1254_v0 = vmul.f32 %v2657_v32, %v1238_v10 }
 0x3ea   : > { %1270 = vst [vmem:[%s2680_s21 + $0x78] sm:$0xff] %v1254_v0 }
 0x3eb   : > { %v2018_v23 = vpop.eup %2017  ;;  %1277 = sbr.rel (!%p2172_p4) target bundleno = 1049 (0x419), region = 52 }
 0x3ec   : > { %v1237_v14 = vsel %vm934_vm2, %v2016_v13, %v2018_v23 }
 0x3ed   : > { %v1253_v16 = vmul.f32 %v2665_v51, %v1237_v14 }
 0x3ef   : > { %1269 = vst [vmem:[%s2680_s21 + $0x70] sm:$0xff] %v1253_v16 }
 0x3f0   : > { %s2859_s24 = smov (!%p1280_p8, %s1279_s24), 16 }
 0x3f1   : > { %s1591_s30 = sshll.u32 %s2859_s24, 7 }
 0x3f2   : > { %p1594_p9 = scmp.eq.s32.totalorder %s1591_s30, 0 }
 0x3f3   : > { %s2756_s15 = sshrl.u32 (!%p1594_p9), %s2859_s24, 4 }
 0x3f4   : > { %1288 = sbr.rel (%p1594_p9) target bundleno = 1049 (0x419), region = 56  ;;  %p1595_p10 = scmp.le.s32.totalorder (!%p1594_p9), %s2756_s15, 0 }
 0x3f9   : > { %1503 = sbr.rel (%p1595_p10) target bundleno = 1032 (0x408), region = 132  ;;  %s2852_s27 = smov (!%p1595_p10), %s2750_s29 }
 0x3fa   : > { %s2853_s9 = smov (!%p1595_p10), %s2680_s21  ;;  %s2765_s14 = smov (!%p1595_p10), 0  }
 0x3fb   : > { %s2767_s10 = smov (!%p1595_p10), 0  }
 0x3fe LB: >> { %v1381_v17 = vld [vmem:[%s2081_s9] sm:$0xff]  ;;  %v1383_v28 = vld [vmem:[%s2081_s9 + $0x8] sm:$0xff]  ;;  %v1385_v32 = vld [vmem:[%s2081_s9 + $0x10] sm:$0xff]  ;;  %s1413_s11 = sadd.s32 1, %s2085_s14  ;;  %s1375_s10 = sadd.s32 1, %s2089_s10   ;;  %s2089_s10 = sphi %s2767_s10, %s1375_s10   ;;  %s2085_s14 = sphi %s2765_s14, %s2854_s14   ;;  %s2081_s9 = sphi %s2853_s9, %s1418_s9   ;;  %s2077_s27 = sphi %s2852_s27, %s1419_s27  }
 0x3ff   : >> { %1382 = vst [vmem:[%s2077_s27] sm:$0xff] %v1381_v17  ;;  %1384 = vst [vmem:[%s2077_s27 + $0x8] sm:$0xff] %v1383_v28  ;;  %v1387_v51 = vld [vmem:[%s2081_s9 + $0x18] sm:$0xff]  ;;  %v1389_v43 = vld [vmem:[%s2081_s9 + $0x20] sm:$0xff]  ;;  %p1414_p11 = scmp.ge.s32.totalorder %s1413_s11, %s2756_s15  ;;  %p1374_p12 = scmp.ge.s32.totalorder %s1375_s10, %s2756_s15 }
 0x400   : >> { %1386 = vst [vmem:[%s2077_s27 + $0x10] sm:$0xff] %v1385_v32  ;;  %v1391_v44 = vld [vmem:[%s2081_s9 + $0x28] sm:$0xff]  ;;  %1388 = vst [vmem:[%s2077_s27 + $0x18] sm:$0xff] %v1387_v51  ;;  %v1393_v19 = vld [vmem:[%s2081_s9 + $0x30] sm:$0xff] }
 0x401   : >> { %1390 = vst [vmem:[%s2077_s27 + $0x20] sm:$0xff] %v1389_v43  ;;  %1392 = vst [vmem:[%s2077_s27 + $0x28] sm:$0xff] %v1391_v44  ;;  %v1395_v11 = vld [vmem:[%s2081_s9 + $0x38] sm:$0xff]  ;;  %v1397_v12 = vld [vmem:[%s2081_s9 + $0x40] sm:$0xff]  ;;  %s2861_s11 = smov (%p1414_p11, %s1413_s11), 0 }
 0x402   : >> { %1394 = vst [vmem:[%s2077_s27 + $0x30] sm:$0xff] %v1393_v19  ;;  %1396 = vst [vmem:[%s2077_s27 + $0x38] sm:$0xff] %v1395_v11  ;;  %v1399_v18 = vld [vmem:[%s2081_s9 + $0x48] sm:$0xff]  ;;  %v1401_v24 = vld [vmem:[%s2081_s9 + $0x50] sm:$0xff]  ;;  %s1596_s12 = sshll.u32 %s2861_s11, 7  ;;  %s2854_s14 = smov %s2861_s11 }
 0x403   : >> { %1398 = vst [vmem:[%s2077_s27 + $0x40] sm:$0xff] %v1397_v12  ;;  %v1403_v25 = vld [vmem:[%s2081_s9 + $0x58] sm:$0xff]  ;;  %1400 = vst [vmem:[%s2077_s27 + $0x48] sm:$0xff] %v1399_v18  ;;  %v1405_v29 = vld [vmem:[%s2081_s9 + $0x60] sm:$0xff]  ;;  %1377 = sbr.rel (!%p1374_p12) target bundleno = 1022 (0x3fe), region = 138 }
 0x404   : >> { %1402 = vst [vmem:[%s2077_s27 + $0x50] sm:$0xff] %v1401_v24  ;;  %1404 = vst [vmem:[%s2077_s27 + $0x58] sm:$0xff] %v1403_v25  ;;  %v1407_v30 = vld [vmem:[%s2081_s9 + $0x68] sm:$0xff]  ;;  %v1409_v33 = vld [vmem:[%s2081_s9 + $0x70] sm:$0xff] }
 0x405   : >> { %1406 = vst [vmem:[%s2077_s27 + $0x60] sm:$0xff] %v1405_v29  ;;  %1408 = vst [vmem:[%s2077_s27 + $0x68] sm:$0xff] %v1407_v30  ;;  %v1411_v27 = vld [vmem:[%s2081_s9 + $0x78] sm:$0xff]  ;;  %s1418_s9 = scalar_lea.vmem %s2680_s21, %s1596_s12 [#allocation2]  }
 0x406   : >> { %1410 = vst [vmem:[%s2077_s27 + $0x70] sm:$0xff] %v1409_v33  ;;  %1412 = vst [vmem:[%s2077_s27 + $0x78] sm:$0xff] %v1411_v27  ;;  %s1419_s27 = scalar_lea.vmem %s2750_s29, %s1596_s12  }
 0x408 PF: > { %s2825_s13 = sand.u32 15, %s2859_s24   ;;  %s1607_s16 = sshll.u32 %s2756_s15, 7 }
 0x409   : > { %s1424_s17 = scalar_lea.vmem %s2680_s21, %s1607_s16 [#allocation2]   ;;  %s1426_s18 = scalar_lea.vmem %s2750_s29, %s1607_s16  }
 0x40a   : > { %p1601_p13 = scmp.le.s32.totalorder %s2825_s13, 0 }
 0x40b   : > { %s2091_s19 = smov (!%p1601_p13), %s1426_s18   ;;  %s2095_s20 = smov (!%p1601_p13), %s1424_s17  }
 0x40c   : > { %1517 = sbr.rel (%p1601_p13) target bundleno = 1049 (0x419), region = 143  ;;  %s2099_s22 = smov (!%p1601_p13), 0  }
 0x40d   : > { %s2103_s23 = smov (!%p1601_p13), 0  }
 0x411 LB: >> { %v1436_v34 = vld [vmem:[%s2097_s20] sm:$0xff]  ;;  %s1438_s24 = sadd.s32 1, %s2101_s22  ;;  %s1430_s23 = sadd.s32 1, %s2105_s23   ;;  %s2105_s23 = sphi %s2103_s23, %s1430_s23   ;;  %s2101_s22 = sphi %s2099_s22, %s2100_s22   ;;  %s2097_s20 = sphi %s2095_s20, %s1443_s20   ;;  %s2093_s19 = sphi %s2091_s19, %s1444_s19  }
 0x412   : >> { %1437 = vst [vmem:[%s2093_s19] sm:$0xff] %v1436_v34  ;;  %p1439_p0 = scmp.ge.s32.totalorder %s1438_s24, %s2825_s13  ;;  %p1429_p1 = scmp.ge.s32.totalorder %s1430_s23, %s2825_s13 }
 0x414   : >> { %s2863_s24 = smov (%p1439_p0, %s1438_s24), 0  ;;  %1432 = sbr.rel (!%p1429_p1) target bundleno = 1041 (0x411), region = 149 }
 0x415   : >> { %s1602_s21 = sshll.u32 %s2863_s24, 3  ;;  %s2100_s22 = smov %s2863_s24  }
 0x416   : >> { %s1443_s20 = scalar_lea.vmem %s1424_s17, %s1602_s21 [#allocation2]   ;;  %s1444_s19 = scalar_lea.vmem %s1426_s18, %s1602_s21  }
 0x419 PF: > { %p14_p2 = scmp.ge.s32.totalorder %s2162_s28, 5   ;;  %s2855_s24 = smov %s2069_s25 }
 0x41a   : > { %s2856_s25 = smov %s2170_s8  ;;  %s2857_s26 = smov %s2162_s28 }
 0x41b   :  { %16 = sbr.rel (!%p14_p2) target bundleno = 2 (0x2), region = 160 }

</bundles_post_ra>
